<compile_context>
chip_gen: v7x
topology: tpu7x:2x2x1
jax: 0.10.0
libtpu: 0.0.40
codegen_flags: <defaults>
</compile_context>

<pallas_src>
import functools

import jax
import jax.numpy as jnp
from jax import lax
from jax.experimental import pallas as pl
from jax.experimental.pallas import tpu as pltpu


def _round_up(x, m):
    return ((x + m - 1) // m) * m


def _cdiv(a, b):
    return -(-a // b)


def _device_budget():
    """Per-generation sizing: (row-tile cap, vocab-tile cap, vmem_limit_bytes)."""
    try:
        vmem_cap = int(pltpu.get_tpu_info().vmem_capacity_bytes)
    except Exception:  # query unavailable -> conservative (v7x-sized) fallback
        vmem_cap = 64 * 2 ** 20
    # Leave headroom for Mosaic internal scratch / output buffers / semaphores.
    vmem_limit = min(int(0.75 * vmem_cap), 100 * 2 ** 20)
    mt_cap = 1024 if vmem_cap >= 100 * 2 ** 20 else 512   # v5e/v6e vs v7x
    return mt_cap, 2048, vmem_limit


def _pick_tiles(m_rows, d_pad, v_pad, mt_cap, vt_cap, budget):
    """Pick (mt, vt): as many rows as VMEM allows (amortizes each weight pass),
    balanced so the last row tile is not mostly padding."""
    mt = min(mt_cap, _round_up(m_rows, 8))
    n_mt = max(1, _cdiv(m_rows, mt))
    mt = min(mt, _round_up(_cdiv(m_rows, n_mt), 8))       # balance across tiles
    vt = min(vt_cap, v_pad)

    def est(mt_, vt_):
        return (2 * mt_ * d_pad * 2          # x tile, double-buffered bf16
                + 2 * d_pad * vt_ * 2        # w tile, double-buffered bf16
                + 4 * mt_ * vt_ * 4          # f32 logits / exp temporaries
                + 5 * mt_ * 128 * 4)         # (mt,1) scratch + out (lane-padded)

    while est(mt, vt) > budget and vt > 128:
        vt = max(128, (vt // 2 // 128) * 128)
    while est(mt, vt) > budget and mt > 8:
        mt = max(8, (mt // 2 // 8) * 8)
    return mt, vt


def _masked_nll_head_kernel(x_ref, w_ref, tgt_ref, mask_ref, out_ref,
                            m_sc, l_sc, t_sc, *, v_real, needs_mask):
    """grid = (M_tiles, V_tiles) with vocab as the trailing 'arbitrary' axis.
    Per M tile: stream vocab tiles, keep an online log-sum-exp + target-logit
    accumulator in VMEM scratch, emit masked per-row NLL at the last tile."""
    j = pl.program_id(1)

    @pl.when(j == 0)
    def _():
        m_sc[...] = jnp.full_like(m_sc, -1e30)   # running max (finite sentinel)
        l_sc[...] = jnp.zeros_like(l_sc)         # running sum-exp
        t_sc[...] = jnp.zeros_like(t_sc)         # target logit

    # MXU: bf16 x bf16 -> f32 accumulate.  All elementwise math below is f32.
    logits = jnp.dot(x_ref[...], w_ref[...], preferred_element_type=jnp.float32)
    mt, vt = logits.shape
    base = j * vt                                          # global vocab offset
    col = lax.broadcasted_iota(jnp.int32, (mt, vt), 1)

    def update(lg):
        # Online (flash-style) log-sum-exp across vocab tiles.
        m_prev = m_sc[...]
        m_new = jnp.maximum(m_prev, jnp.max(lg, axis=-1, keepdims=True))
        alpha = jnp.exp(m_prev - m_new)
        l_sc[...] = alpha * l_sc[...] + jnp.sum(jnp.exp(lg - m_new),
                                                axis=-1, keepdims=True)
        m_sc[...] = m_new
        # Target logit via where-select (no int->f32 one-hot multiply); the
        # target column falls in exactly one (real, unmasked) vocab tile.
        t_sc[...] = t_sc[...] + jnp.sum(
            jnp.where(col == (tgt_ref[...] - base), lg, jnp.float32(0.0)),
            axis=-1, keepdims=True)

    last = j == pl.num_programs(1) - 1
    if needs_mask:
        # Padded / ragged columns only exist in the final vocab tile (vt is a
        # multiple of 128 and V is padded to 128), so gate the (mt, vt)
        # compare+select to that tile only.
        @pl.when(jnp.logical_not(last))
        def _():
            update(logits)

        @pl.when(last)
        def _():
            update(jnp.where(col < (v_real - base), logits, jnp.float32(-1e30)))
    else:
        update(logits)

    @pl.when(last)
    def _():
        # nll = logsumexp - target_logit  (no (mt, vt) logprobs intermediate).
        nll = m_sc[...] + jnp.log(l_sc[...]) - t_sc[...]
        out_ref[...] = nll * mask_ref[...]


def prepare_head_weight(w):
    """One-time (init-time) weight prep: cast to bf16, pad D to the bf16
    sublane multiple (16) and V to a lane multiple (128).  Keeps the per-step
    path free of full-weight casts / copies in XLA."""
    D, V = w.shape
    d_pad = _round_up(D, 16)
    v_pad = _round_up(V, 128)
    return jnp.pad(w.astype(jnp.bfloat16), ((0, d_pad - D), (0, v_pad - V)))


def _masked_nll_head(x, w_prepped, v_real, targets, mask):
    """x: (M, D) float, w_prepped: (d_pad, v_pad128) bf16 (pre-cast/padded),
    targets: (M,) int, mask: (M,) float -> sum over rows of mask * nll."""
    M, D = x.shape
    w_prepped = w_prepped.astype(jnp.bfloat16)   # no-op if already bf16
    d_pad, v_pad = w_prepped.shape

    mt_cap, vt_cap, vmem_limit = _device_budget()
    mt, vt = _pick_tiles(M, d_pad, v_pad, mt_cap, vt_cap, vmem_limit)
    m_pad = _round_up(M, mt)
    n_vt = pl.cdiv(v_pad, vt)
    needs_mask = (v_pad != v_real) or (v_pad % vt != 0)

    # Per-step activation prep only (activations are tiny next to the weights);
    # zero padding is exact for the matmul and masked rows contribute 0.
    x_p = jnp.pad(x.astype(jnp.bfloat16), ((0, m_pad - M), (0, d_pad - D)))
    tgt_p = jnp.pad(targets.astype(jnp.int32), (0, m_pad - M)).reshape(m_pad, 1)
    msk_p = jnp.pad(mask.astype(jnp.float32), (0, m_pad - M)).reshape(m_pad, 1)

    kernel = functools.partial(_masked_nll_head_kernel, v_real=v_real,
                               needs_mask=needs_mask)

    out = pl.pallas_call(
        kernel,
        out_shape=jax.ShapeDtypeStruct((m_pad, 1), jnp.float32),
        grid_spec=pltpu.PrefetchScalarGridSpec(
            num_scalar_prefetch=0,
            grid=(m_pad // mt, n_vt),
            in_specs=[
                # x rows: resident across the vocab (reduction) axis.
                pl.BlockSpec((mt, d_pad), lambda i, j: (i, 0)),
                # streamed weight tiles; re-fetched only once per row tile.
                # TODO(synk): add pipeline_mode=pl.Buffered(3) here if a trace
                # shows exposed weight DMA at tile boundaries.
                pl.BlockSpec((d_pad, vt), lambda i, j: (0, j)),
                pl.BlockSpec((mt, 1), lambda i, j: (i, 0)),       # targets
                pl.BlockSpec((mt, 1), lambda i, j: (i, 0)),       # mask
            ],
            out_specs=pl.BlockSpec((mt, 1), lambda i, j: (i, 0)),
            scratch_shapes=[pltpu.VMEM((mt, 1), jnp.float32)] * 3,
        ),
        compiler_params=pltpu.CompilerParams(
            dimension_semantics=("parallel", "arbitrary"),
            vmem_limit_bytes=int(vmem_limit),
        ),
    )(x_p, w_prepped, tgt_p, msk_p)

    return jnp.sum(out)   # tiny final reduce in JAX (padded rows contribute 0)


def init_params(key, feat_dim, vocab_size, status_size):
    k1, k2, k3, k4 = jax.random.split(key, 4)
    scale = 0.02
    w_tok = scale * jax.random.normal(k3, (feat_dim, vocab_size), jnp.float32)
    w_sta = scale * jax.random.normal(k4, (feat_dim, status_size), jnp.float32)
    return {
        "emb_tok": scale * jax.random.normal(k1, (vocab_size, feat_dim), jnp.float32),
        "emb_sta": scale * jax.random.normal(k2, (status_size, feat_dim), jnp.float32),
        # Head weights stored already bf16-cast and 16/128-padded (hoisted out
        # of the training step -- no full-weight cast/pad in XLA per step).
        "w_tok": prepare_head_weight(w_tok),
        "w_sta": prepare_head_weight(w_sta),
    }


def loss_wrapper_forward(params, fc_feats, labels, masks, status, *,
                         vocab_size, status_size):
    """sc_flag=False branch of LossWrapper.forward.

    fc_feats: (B, D) f32, labels: (B, L) i32 (BOS at 0), masks: (B, L) f32,
    status: (B, L) i32.
    """
    B, L = labels.shape
    T = L - 1
    D = fc_feats.shape[1]

    # --- synthetic model inputs (glue, plain JAX) ---------------------------
    # TODO(synk): the embedding row-gather + feature add stays in XLA; fusing it
    # into the Pallas kernel would need a manual DMA gather (not a rectangular
    # BlockSpec), which is not worth it for this stand-in model.
    prev_tok = labels[:, :-1]
    prev_sta = status[:, :-1]
    x_tok = (fc_feats[:, None, :] + params["emb_tok"][prev_tok]).reshape(B * T, D)
    x_sta = (fc_feats[:, None, :] + params["emb_sta"][prev_sta]).reshape(B * T, D)

    tgt_tok = labels[:, 1:].reshape(-1)
    tgt_sta = status[:, 1:].reshape(-1)
    # Both criteria in the original are fed the same token mask (masks[:, 1:]).
    msk = masks[:, 1:].reshape(-1).astype(jnp.float32)

    # den hoisted out of the kernel, computed once, guarded against 0/0.
    den = jnp.maximum(jnp.sum(msk), 1.0)

    # --- fused Pallas hot path: head matmul + online LSE + masked NLL -------
    # TODO(synk): the two heads could share one pallas_call via a prefetched
    # head-id -> concatenated-vocab mapping; kept as two calls (the status head
    # is a single 128-lane weight tile, so its standalone cost is launch-only).
    token_loss = _masked_nll_head(x_tok, params["w_tok"], vocab_size,
                                  tgt_tok, msk) / den
    status_loss = _masked_nll_head(x_sta, params["w_sta"], status_size,
                                   tgt_sta, msk) / den

    # TODO(synk): sc_flag=True branch (sampled decoding, restore_sentence,
    # CIDEr self-critical reward) has no clean Pallas equivalent and is omitted.
    loss = token_loss + status_loss
    return {"token_loss": token_loss, "status_loss": status_loss, "loss": loss}


if __name__ == "__main__":
    B, D, L = 2, 32, 9            # B*T = 16 rows
    VOCAB, STATUS = 250, 120      # deliberately not multiples of 128 -> exercises vocab padding

    key = jax.random.PRNGKey(0)
    kp, kf, kl, ks, km = jax.random.split(key, 5)

    params = init_params(kp, D, VOCAB, STATUS)

    fc_feats = jax.random.normal(kf, (B, D), jnp.float32)
    labels = jax.random.randint(kl, (B, L), 1, VOCAB, jnp.int32)
    status = jax.random.randint(ks, (B, L), 0, STATUS, jnp.int32)

    # masks: 1 for the first `len` positions, 0 after (lengths in [4, L]).
    lengths = jax.random.randint(km, (B, 1), 4, L + 1, jnp.int32)
    masks = (jnp.arange(L)[None, :] < lengths).astype(jnp.float32)

    fwd = jax.jit(functools.partial(loss_wrapper_forward,
                                    vocab_size=VOCAB, status_size=STATUS))
    out = fwd(params, fc_feats, labels, masks, status)
    out = jax.block_until_ready(out)

    # Pure-JAX reference with the same bf16 operand precision.
    def ref_head(x, w_prepped, v_real, tgt, msk):
        D_ = x.shape[1]
        xb = x.astype(jnp.bfloat16).astype(jnp.float32)
        wb = w_prepped[:D_, :v_real].astype(jnp.float32)
        lp = jax.nn.log_softmax(xb @ wb, axis=-1)
        nll = -jnp.take_along_axis(lp, tgt[:, None], axis=1)[:, 0]
        return jnp.sum(nll * msk) / jnp.maximum(jnp.sum(msk), 1.0)

    T = L - 1
    prev_tok, prev_sta = labels[:, :-1], status[:, :-1]
    x_tok = (fc_feats[:, None, :] + params["emb_tok"][prev_tok]).reshape(B * T, D)
    x_sta = (fc_feats[:, None, :] + params["emb_sta"][prev_sta]).reshape(B * T, D)
    msk_flat = masks[:, 1:].reshape(-1)
    ref_tok = ref_head(x_tok, params["w_tok"], VOCAB, labels[:, 1:].reshape(-1), msk_flat)
    ref_sta = ref_head(x_sta, params["w_sta"], STATUS, status[:, 1:].reshape(-1), msk_flat)

    assert jnp.isfinite(out["loss"]), "loss is not finite"
    assert jnp.allclose(out["token_loss"], ref_tok, rtol=1e-3, atol=1e-3), (
        float(out["token_loss"]), float(ref_tok))
    assert jnp.allclose(out["status_loss"], ref_sta, rtol=1e-3, atol=1e-3), (
        float(out["status_loss"]), float(ref_sta))
    print("KERNEL_OK")
</pallas_src>

<mosaic_0001>
module attributes {stable_mosaic.version = 11 : i64} {
  func.func @_masked_nll_head_kernel(%arg0: i32, %arg1: i32, %arg2: memref<16x32xbf16, #tpu.memory_space<vmem>>, %arg3: memref<32x128xbf16, #tpu.memory_space<vmem>>, %arg4: memref<16x1xi32, #tpu.memory_space<vmem>>, %arg5: memref<16x1xf32, #tpu.memory_space<vmem>>, %arg6: memref<16x1xf32, #tpu.memory_space<vmem>>, %arg7: memref<16x1xf32, #tpu.memory_space<vmem>>, %arg8: memref<16x1xf32, #tpu.memory_space<vmem>>, %arg9: memref<16x1xf32, #tpu.memory_space<vmem>>) attributes {dimension_semantics = [#tpu.dimension_semantics<parallel>, #tpu.dimension_semantics<arbitrary>], iteration_bounds = array<i64: 1, 1>, scalar_prefetch = 0 : i64, scratch_operands = 3 : i64, tpu.core_type = #tpu.core_type<tc>, window_params = [{transform_indices = @transform_0, window_bounds = array<i64: 16, 32>}, {transform_indices = @transform_1, window_bounds = array<i64: 32, 128>}, {transform_indices = @transform_2, window_bounds = array<i64: 16, 1>}, {transform_indices = @transform_3, window_bounds = array<i64: 16, 1>}, {transform_indices = @transform_4, window_bounds = array<i64: 16, 1>}]} {
    %c0_i32 = arith.constant 0 : i32
    %0 = arith.cmpi eq, %arg1, %c0_i32 : i32
    %1 = arith.extui %0 : i1 to i32
    %c0_i32_0 = arith.constant 0 : i32
    %2 = arith.cmpi ne, %1, %c0_i32_0 : i32
    scf.if %2 {
      %cst_8 = arith.constant -1.000000e+30 : f32
      %16 = vector.broadcast %cst_8 : f32 to vector<16x1xf32>
      %c0_9 = arith.constant 0 : index
      %c0_10 = arith.constant 0 : index
      %17 = vector.load %arg7[%c0_9, %c0_10] : memref<16x1xf32, #tpu.memory_space<vmem>>, vector<16x1xf32>
      tpu.vector_store %arg7[%c0_9, %c0_10], %16 {strides = array<i32>} : memref<16x1xf32, #tpu.memory_space<vmem>>, vector<16x1xf32>,
      %cst_11 = arith.constant 0.000000e+00 : f32
      %18 = vector.broadcast %cst_11 : f32 to vector<16x1xf32>
      %c0_12 = arith.constant 0 : index
      %c0_13 = arith.constant 0 : index
      %19 = vector.load %arg8[%c0_12, %c0_13] : memref<16x1xf32, #tpu.memory_space<vmem>>, vector<16x1xf32>
      tpu.vector_store %arg8[%c0_12, %c0_13], %18 {strides = array<i32>} : memref<16x1xf32, #tpu.memory_space<vmem>>, vector<16x1xf32>,
      %cst_14 = arith.constant 0.000000e+00 : f32
      %20 = vector.broadcast %cst_14 : f32 to vector<16x1xf32>
      %c0_15 = arith.constant 0 : index
      %c0_16 = arith.constant 0 : index
      %21 = vector.load %arg9[%c0_15, %c0_16] : memref<16x1xf32, #tpu.memory_space<vmem>>, vector<16x1xf32>
      tpu.vector_store %arg9[%c0_15, %c0_16], %20 {strides = array<i32>} : memref<16x1xf32, #tpu.memory_space<vmem>>, vector<16x1xf32>,
    } else {
    }
    %c0 = arith.constant 0 : index
    %c0_1 = arith.constant 0 : index
    %3 = vector.load %arg2[%c0, %c0_1] : memref<16x32xbf16, #tpu.memory_space<vmem>>, vector<16x32xbf16>
    %c0_2 = arith.constant 0 : index
    %c0_3 = arith.constant 0 : index
    %4 = vector.load %arg3[%c0_2, %c0_3] : memref<32x128xbf16, #tpu.memory_space<vmem>>, vector<32x128xbf16>
    %cst = arith.constant dense<0.000000e+00> : vector<16x128xf32>
    %5 = tpu.matmul %3, %4, %cst {dimension_numbers = #tpu.dot_dimension_numbers<[1], [0], [0], [1], [0, 0, 1, 1], [], []>} : vector<16x32xbf16>, vector<32x128xbf16>, vector<16x128xf32> -> vector<16x128xf32>
    %c128_i32 = arith.constant 128 : i32
    %6 = arith.muli %arg1, %c128_i32 : i32
    %7 = tpu.iota {dimensions = array<i32: 1>} : vector<16x128xi32>
    %c0_i32_4 = arith.constant 0 : i32
    %8 = arith.cmpi eq, %arg1, %c0_i32_4 : i32
    %true = arith.constant true
    %9 = arith.xori %8, %true : i1
    %10 = arith.extui %9 : i1 to i32
    %c0_i32_5 = arith.constant 0 : i32
    %11 = arith.cmpi ne, %10, %c0_i32_5 : i32
    scf.if %11 {
      %c0_8 = arith.constant 0 : index
      %c0_9 = arith.constant 0 : index
      %16 = vector.load %arg7[%c0_8, %c0_9] : memref<16x1xf32, #tpu.memory_space<vmem>>, vector<16x1xf32>
      %cst_10 = arith.constant dense<0xFF800000> : vector<16xf32>
      %17 = vector.multi_reduction <maximumf>, %5, %cst_10 [1] : vector<16x128xf32> to vector<16xf32>
      %18 = vector.shape_cast %17 : vector<16xf32> to vector<16x1xf32>
      %19 = arith.maximumf %16, %18 : vector<16x1xf32>
      %20 = arith.subf %16, %19 : vector<16x1xf32>
      %21 = math.exp %20 : vector<16x1xf32>
      %c0_11 = arith.constant 0 : index
      %c0_12 = arith.constant 0 : index
      %22 = vector.load %arg8[%c0_11, %c0_12] : memref<16x1xf32, #tpu.memory_space<vmem>>, vector<16x1xf32>
      %23 = arith.mulf %21, %22 : vector<16x1xf32>
      %24 = vector.broadcast %19 : vector<16x1xf32> to vector<16x128xf32>
      %25 = arith.subf %5, %24 : vector<16x128xf32>
      %26 = math.exp %25 : vector<16x128xf32>
      %cst_13 = arith.constant dense<0.000000e+00> : vector<16xf32>
      %27 = vector.multi_reduction <add>, %26, %cst_13 [1] : vector<16x128xf32> to vector<16xf32>
      %28 = vector.shape_cast %27 : vector<16xf32> to vector<16x1xf32>
      %29 = arith.addf %23, %28 : vector<16x1xf32>
      %c0_14 = arith.constant 0 : index
      %c0_15 = arith.constant 0 : index
      %30 = vector.load %arg8[%c0_14, %c0_15] : memref<16x1xf32, #tpu.memory_space<vmem>>, vector<16x1xf32>
      tpu.vector_store %arg8[%c0_14, %c0_15], %29 {strides = array<i32>} : memref<16x1xf32, #tpu.memory_space<vmem>>, vector<16x1xf32>,
      %c0_16 = arith.constant 0 : index
      %c0_17 = arith.constant 0 : index
      %31 = vector.load %arg7[%c0_16, %c0_17] : memref<16x1xf32, #tpu.memory_space<vmem>>, vector<16x1xf32>
      tpu.vector_store %arg7[%c0_16, %c0_17], %19 {strides = array<i32>} : memref<16x1xf32, #tpu.memory_space<vmem>>, vector<16x1xf32>,
      %c0_18 = arith.constant 0 : index
      %c0_19 = arith.constant 0 : index
      %32 = vector.load %arg9[%c0_18, %c0_19] : memref<16x1xf32, #tpu.memory_space<vmem>>, vector<16x1xf32>
      %c0_20 = arith.constant 0 : index
      %c0_21 = arith.constant 0 : index
      %33 = vector.load %arg4[%c0_20, %c0_21] : memref<16x1xi32, #tpu.memory_space<vmem>>, vector<16x1xi32>
      %34 = vector.broadcast %6 : i32 to vector<16x1xi32>
      %35 = arith.subi %33, %34 : vector<16x1xi32>
      %36 = vector.broadcast %35 : vector<16x1xi32> to vector<16x128xi32>
      %37 = arith.cmpi eq, %7, %36 : vector<16x128xi32>
      %cst_22 = arith.constant 0.000000e+00 : f32
      %38 = vector.broadcast %cst_22 : f32 to vector<16x128xf32>
      %39 = arith.select %37, %5, %38 : vector<16x128xi1>, vector<16x128xf32>
      %cst_23 = arith.constant dense<0.000000e+00> : vector<16xf32>
      %40 = vector.multi_reduction <add>, %39, %cst_23 [1] : vector<16x128xf32> to vector<16xf32>
      %41 = vector.shape_cast %40 : vector<16xf32> to vector<16x1xf32>
      %42 = arith.addf %32, %41 : vector<16x1xf32>
      %c0_24 = arith.constant 0 : index
      %c0_25 = arith.constant 0 : index
      %43 = vector.load %arg9[%c0_24, %c0_25] : memref<16x1xf32, #tpu.memory_space<vmem>>, vector<16x1xf32>
      tpu.vector_store %arg9[%c0_24, %c0_25], %42 {strides = array<i32>} : memref<16x1xf32, #tpu.memory_space<vmem>>, vector<16x1xf32>,
    } else {
    }
    %12 = arith.extui %8 : i1 to i32
    %c0_i32_6 = arith.constant 0 : i32
    %13 = arith.cmpi ne, %12, %c0_i32_6 : i32
    scf.if %13 {
      %c120_i32 = arith.constant 120 : i32
      %16 = arith.subi %c120_i32, %6 : i32
      %17 = vector.broadcast %16 : i32 to vector<16x128xi32>
      %18 = arith.cmpi slt, %7, %17 : vector<16x128xi32>
      %cst_8 = arith.constant -1.000000e+30 : f32
      %19 = vector.broadcast %cst_8 : f32 to vector<16x128xf32>
      %20 = arith.select %18, %5, %19 : vector<16x128xi1>, vector<16x128xf32>
      %c0_9 = arith.constant 0 : index
      %c0_10 = arith.constant 0 : index
      %21 = vector.load %arg7[%c0_9, %c0_10] : memref<16x1xf32, #tpu.memory_space<vmem>>, vector<16x1xf32>
      %cst_11 = arith.constant dense<0xFF800000> : vector<16xf32>
      %22 = vector.multi_reduction <maximumf>, %20, %cst_11 [1] : vector<16x128xf32> to vector<16xf32>
      %23 = vector.shape_cast %22 : vector<16xf32> to vector<16x1xf32>
      %24 = arith.maximumf %21, %23 : vector<16x1xf32>
      %25 = arith.subf %21, %24 : vector<16x1xf32>
      %26 = math.exp %25 : vector<16x1xf32>
      %c0_12 = arith.constant 0 : index
      %c0_13 = arith.constant 0 : index
      %27 = vector.load %arg8[%c0_12, %c0_13] : memref<16x1xf32, #tpu.memory_space<vmem>>, vector<16x1xf32>
      %28 = arith.mulf %26, %27 : vector<16x1xf32>
      %29 = vector.broadcast %24 : vector<16x1xf32> to vector<16x128xf32>
      %30 = arith.subf %20, %29 : vector<16x128xf32>
      %31 = math.exp %30 : vector<16x128xf32>
      %cst_14 = arith.constant dense<0.000000e+00> : vector<16xf32>
      %32 = vector.multi_reduction <add>, %31, %cst_14 [1] : vector<16x128xf32> to vector<16xf32>
      %33 = vector.shape_cast %32 : vector<16xf32> to vector<16x1xf32>
      %34 = arith.addf %28, %33 : vector<16x1xf32>
      %c0_15 = arith.constant 0 : index
      %c0_16 = arith.constant 0 : index
      %35 = vector.load %arg8[%c0_15, %c0_16] : memref<16x1xf32, #tpu.memory_space<vmem>>, vector<16x1xf32>
      tpu.vector_store %arg8[%c0_15, %c0_16], %34 {strides = array<i32>} : memref<16x1xf32, #tpu.memory_space<vmem>>, vector<16x1xf32>,
      %c0_17 = arith.constant 0 : index
      %c0_18 = arith.constant 0 : index
      %36 = vector.load %arg7[%c0_17, %c0_18] : memref<16x1xf32, #tpu.memory_space<vmem>>, vector<16x1xf32>
      tpu.vector_store %arg7[%c0_17, %c0_18], %24 {strides = array<i32>} : memref<16x1xf32, #tpu.memory_space<vmem>>, vector<16x1xf32>,
      %c0_19 = arith.constant 0 : index
      %c0_20 = arith.constant 0 : index
      %37 = vector.load %arg9[%c0_19, %c0_20] : memref<16x1xf32, #tpu.memory_space<vmem>>, vector<16x1xf32>
      %c0_21 = arith.constant 0 : index
      %c0_22 = arith.constant 0 : index
      %38 = vector.load %arg4[%c0_21, %c0_22] : memref<16x1xi32, #tpu.memory_space<vmem>>, vector<16x1xi32>
      %39 = vector.broadcast %6 : i32 to vector<16x1xi32>
      %40 = arith.subi %38, %39 : vector<16x1xi32>
      %41 = vector.broadcast %40 : vector<16x1xi32> to vector<16x128xi32>
      %42 = arith.cmpi eq, %7, %41 : vector<16x128xi32>
      %cst_23 = arith.constant 0.000000e+00 : f32
      %43 = vector.broadcast %cst_23 : f32 to vector<16x128xf32>
      %44 = arith.select %42, %20, %43 : vector<16x128xi1>, vector<16x128xf32>
      %cst_24 = arith.constant dense<0.000000e+00> : vector<16xf32>
      %45 = vector.multi_reduction <add>, %44, %cst_24 [1] : vector<16x128xf32> to vector<16xf32>
      %46 = vector.shape_cast %45 : vector<16xf32> to vector<16x1xf32>
      %47 = arith.addf %37, %46 : vector<16x1xf32>
      %c0_25 = arith.constant 0 : index
      %c0_26 = arith.constant 0 : index
      %48 = vector.load %arg9[%c0_25, %c0_26] : memref<16x1xf32, #tpu.memory_space<vmem>>, vector<16x1xf32>
      tpu.vector_store %arg9[%c0_25, %c0_26], %47 {strides = array<i32>} : memref<16x1xf32, #tpu.memory_space<vmem>>, vector<16x1xf32>,
    } else {
    }
    %14 = arith.extui %8 : i1 to i32
    %c0_i32_7 = arith.constant 0 : i32
    %15 = arith.cmpi ne, %14, %c0_i32_7 : i32
    scf.if %15 {
      %c0_8 = arith.constant 0 : index
      %c0_9 = arith.constant 0 : index
      %16 = vector.load %arg7[%c0_8, %c0_9] : memref<16x1xf32, #tpu.memory_space<vmem>>, vector<16x1xf32>
      %c0_10 = arith.constant 0 : index
      %c0_11 = arith.constant 0 : index
      %17 = vector.load %arg8[%c0_10, %c0_11] : memref<16x1xf32, #tpu.memory_space<vmem>>, vector<16x1xf32>
      %18 = math.log %17 : vector<16x1xf32>
      %19 = arith.addf %16, %18 : vector<16x1xf32>
      %c0_12 = arith.constant 0 : index
      %c0_13 = arith.constant 0 : index
      %20 = vector.load %arg9[%c0_12, %c0_13] : memref<16x1xf32, #tpu.memory_space<vmem>>, vector<16x1xf32>
      %21 = arith.subf %19, %20 : vector<16x1xf32>
      %c0_14 = arith.constant 0 : index
      %c0_15 = arith.constant 0 : index
      %22 = vector.load %arg5[%c0_14, %c0_15] : memref<16x1xf32, #tpu.memory_space<vmem>>, vector<16x1xf32>
      %23 = arith.mulf %21, %22 : vector<16x1xf32>
      %c0_16 = arith.constant 0 : index
      %c0_17 = arith.constant 0 : index
      %24 = vector.load %arg6[%c0_16, %c0_17] : memref<16x1xf32, #tpu.memory_space<vmem>>, vector<16x1xf32>
      tpu.vector_store %arg6[%c0_16, %c0_17], %23 {strides = array<i32>} : memref<16x1xf32, #tpu.memory_space<vmem>>, vector<16x1xf32>,
    } else {
    }
    return
  }
  func.func @transform_0(%arg0: i32, %arg1: i32) -> (i32, i32) {
    %c0_i32 = arith.constant 0 : i32
    %c0_i32_0 = arith.constant 0 : i32
    return %arg0, %c0_i32 : i32, i32
  }
  func.func @transform_1(%arg0: i32, %arg1: i32) -> (i32, i32) {
    %c0_i32 = arith.constant 0 : i32
    %c0_i32_0 = arith.constant 0 : i32
    return %c0_i32, %arg1 : i32, i32
  }
  func.func @transform_2(%arg0: i32, %arg1: i32) -> (i32, i32) {
    %c0_i32 = arith.constant 0 : i32
    %c0_i32_0 = arith.constant 0 : i32
    return %arg0, %c0_i32 : i32, i32
  }
  func.func @transform_3(%arg0: i32, %arg1: i32) -> (i32, i32) {
    %c0_i32 = arith.constant 0 : i32
    %c0_i32_0 = arith.constant 0 : i32
    return %arg0, %c0_i32 : i32, i32
  }
  func.func @transform_4(%arg0: i32, %arg1: i32) -> (i32, i32) {
    %c0_i32 = arith.constant 0 : i32
    %c0_i32_0 = arith.constant 0 : i32
    return %arg0, %c0_i32 : i32, i32
  }
}

module attributes {stable_mosaic.version = 11 : i64} {
  func.func @_masked_nll_head_kernel(%arg0: i32, %arg1: i32, %arg2: memref<16x32xbf16, #tpu.memory_space<vmem>>, %arg3: memref<32x256xbf16, #tpu.memory_space<vmem>>, %arg4: memref<16x1xi32, #tpu.memory_space<vmem>>, %arg5: memref<16x1xf32, #tpu.memory_space<vmem>>, %arg6: memref<16x1xf32, #tpu.memory_space<vmem>>, %arg7: memref<16x1xf32, #tpu.memory_space<vmem>>, %arg8: memref<16x1xf32, #tpu.memory_space<vmem>>, %arg9: memref<16x1xf32, #tpu.memory_space<vmem>>) attributes {dimension_semantics = [#tpu.dimension_semantics<parallel>, #tpu.dimension_semantics<arbitrary>], iteration_bounds = array<i64: 1, 1>, scalar_prefetch = 0 : i64, scratch_operands = 3 : i64, tpu.core_type = #tpu.core_type<tc>, window_params = [{transform_indices = @transform_0, window_bounds = array<i64: 16, 32>}, {transform_indices = @transform_1, window_bounds = array<i64: 32, 256>}, {transform_indices = @transform_2, window_bounds = array<i64: 16, 1>}, {transform_indices = @transform_3, window_bounds = array<i64: 16, 1>}, {transform_indices = @transform_4, window_bounds = array<i64: 16, 1>}]} {
    %c0_i32 = arith.constant 0 : i32
    %0 = arith.cmpi eq, %arg1, %c0_i32 : i32
    %1 = arith.extui %0 : i1 to i32
    %c0_i32_0 = arith.constant 0 : i32
    %2 = arith.cmpi ne, %1, %c0_i32_0 : i32
    scf.if %2 {
      %cst_8 = arith.constant -1.000000e+30 : f32
      %16 = vector.broadcast %cst_8 : f32 to vector<16x1xf32>
      %c0_9 = arith.constant 0 : index
      %c0_10 = arith.constant 0 : index
      %17 = vector.load %arg7[%c0_9, %c0_10] : memref<16x1xf32, #tpu.memory_space<vmem>>, vector<16x1xf32>
      tpu.vector_store %arg7[%c0_9, %c0_10], %16 {strides = array<i32>} : memref<16x1xf32, #tpu.memory_space<vmem>>, vector<16x1xf32>,
      %cst_11 = arith.constant 0.000000e+00 : f32
      %18 = vector.broadcast %cst_11 : f32 to vector<16x1xf32>
      %c0_12 = arith.constant 0 : index
      %c0_13 = arith.constant 0 : index
      %19 = vector.load %arg8[%c0_12, %c0_13] : memref<16x1xf32, #tpu.memory_space<vmem>>, vector<16x1xf32>
      tpu.vector_store %arg8[%c0_12, %c0_13], %18 {strides = array<i32>} : memref<16x1xf32, #tpu.memory_space<vmem>>, vector<16x1xf32>,
      %cst_14 = arith.constant 0.000000e+00 : f32
      %20 = vector.broadcast %cst_14 : f32 to vector<16x1xf32>
      %c0_15 = arith.constant 0 : index
      %c0_16 = arith.constant 0 : index
      %21 = vector.load %arg9[%c0_15, %c0_16] : memref<16x1xf32, #tpu.memory_space<vmem>>, vector<16x1xf32>
      tpu.vector_store %arg9[%c0_15, %c0_16], %20 {strides = array<i32>} : memref<16x1xf32, #tpu.memory_space<vmem>>, vector<16x1xf32>,
    } else {
    }
    %c0 = arith.constant 0 : index
    %c0_1 = arith.constant 0 : index
    %3 = vector.load %arg2[%c0, %c0_1] : memref<16x32xbf16, #tpu.memory_space<vmem>>, vector<16x32xbf16>
    %c0_2 = arith.constant 0 : index
    %c0_3 = arith.constant 0 : index
    %4 = vector.load %arg3[%c0_2, %c0_3] : memref<32x256xbf16, #tpu.memory_space<vmem>>, vector<32x256xbf16>
    %cst = arith.constant dense<0.000000e+00> : vector<16x256xf32>
    %5 = tpu.matmul %3, %4, %cst {dimension_numbers = #tpu.dot_dimension_numbers<[1], [0], [0], [1], [0, 0, 1, 1], [], []>} : vector<16x32xbf16>, vector<32x256xbf16>, vector<16x256xf32> -> vector<16x256xf32>
    %c256_i32 = arith.constant 256 : i32
    %6 = arith.muli %arg1, %c256_i32 : i32
    %7 = tpu.iota {dimensions = array<i32: 1>} : vector<16x256xi32>
    %c0_i32_4 = arith.constant 0 : i32
    %8 = arith.cmpi eq, %arg1, %c0_i32_4 : i32
    %true = arith.constant true
    %9 = arith.xori %8, %true : i1
    %10 = arith.extui %9 : i1 to i32
    %c0_i32_5 = arith.constant 0 : i32
    %11 = arith.cmpi ne, %10, %c0_i32_5 : i32
    scf.if %11 {
      %c0_8 = arith.constant 0 : index
      %c0_9 = arith.constant 0 : index
      %16 = vector.load %arg7[%c0_8, %c0_9] : memref<16x1xf32, #tpu.memory_space<vmem>>, vector<16x1xf32>
      %cst_10 = arith.constant dense<0xFF800000> : vector<16xf32>
      %17 = vector.multi_reduction <maximumf>, %5, %cst_10 [1] : vector<16x256xf32> to vector<16xf32>
      %18 = vector.shape_cast %17 : vector<16xf32> to vector<16x1xf32>
      %19 = arith.maximumf %16, %18 : vector<16x1xf32>
      %20 = arith.subf %16, %19 : vector<16x1xf32>
      %21 = math.exp %20 : vector<16x1xf32>
      %c0_11 = arith.constant 0 : index
      %c0_12 = arith.constant 0 : index
      %22 = vector.load %arg8[%c0_11, %c0_12] : memref<16x1xf32, #tpu.memory_space<vmem>>, vector<16x1xf32>
      %23 = arith.mulf %21, %22 : vector<16x1xf32>
      %24 = vector.broadcast %19 : vector<16x1xf32> to vector<16x256xf32>
      %25 = arith.subf %5, %24 : vector<16x256xf32>
      %26 = math.exp %25 : vector<16x256xf32>
      %cst_13 = arith.constant dense<0.000000e+00> : vector<16xf32>
      %27 = vector.multi_reduction <add>, %26, %cst_13 [1] : vector<16x256xf32> to vector<16xf32>
      %28 = vector.shape_cast %27 : vector<16xf32> to vector<16x1xf32>
      %29 = arith.addf %23, %28 : vector<16x1xf32>
      %c0_14 = arith.constant 0 : index
      %c0_15 = arith.constant 0 : index
      %30 = vector.load %arg8[%c0_14, %c0_15] : memref<16x1xf32, #tpu.memory_space<vmem>>, vector<16x1xf32>
      tpu.vector_store %arg8[%c0_14, %c0_15], %29 {strides = array<i32>} : memref<16x1xf32, #tpu.memory_space<vmem>>, vector<16x1xf32>,
      %c0_16 = arith.constant 0 : index
      %c0_17 = arith.constant 0 : index
      %31 = vector.load %arg7[%c0_16, %c0_17] : memref<16x1xf32, #tpu.memory_space<vmem>>, vector<16x1xf32>
      tpu.vector_store %arg7[%c0_16, %c0_17], %19 {strides = array<i32>} : memref<16x1xf32, #tpu.memory_space<vmem>>, vector<16x1xf32>,
      %c0_18 = arith.constant 0 : index
      %c0_19 = arith.constant 0 : index
      %32 = vector.load %arg9[%c0_18, %c0_19] : memref<16x1xf32, #tpu.memory_space<vmem>>, vector<16x1xf32>
      %c0_20 = arith.constant 0 : index
      %c0_21 = arith.constant 0 : index
      %33 = vector.load %arg4[%c0_20, %c0_21] : memref<16x1xi32, #tpu.memory_space<vmem>>, vector<16x1xi32>
      %34 = vector.broadcast %6 : i32 to vector<16x1xi32>
      %35 = arith.subi %33, %34 : vector<16x1xi32>
      %36 = vector.broadcast %35 : vector<16x1xi32> to vector<16x256xi32>
      %37 = arith.cmpi eq, %7, %36 : vector<16x256xi32>
      %cst_22 = arith.constant 0.000000e+00 : f32
      %38 = vector.broadcast %cst_22 : f32 to vector<16x256xf32>
      %39 = arith.select %37, %5, %38 : vector<16x256xi1>, vector<16x256xf32>
      %cst_23 = arith.constant dense<0.000000e+00> : vector<16xf32>
      %40 = vector.multi_reduction <add>, %39, %cst_23 [1] : vector<16x256xf32> to vector<16xf32>
      %41 = vector.shape_cast %40 : vector<16xf32> to vector<16x1xf32>
      %42 = arith.addf %32, %41 : vector<16x1xf32>
      %c0_24 = arith.constant 0 : index
      %c0_25 = arith.constant 0 : index
      %43 = vector.load %arg9[%c0_24, %c0_25] : memref<16x1xf32, #tpu.memory_space<vmem>>, vector<16x1xf32>
      tpu.vector_store %arg9[%c0_24, %c0_25], %42 {strides = array<i32>} : memref<16x1xf32, #tpu.memory_space<vmem>>, vector<16x1xf32>,
    } else {
    }
    %12 = arith.extui %8 : i1 to i32
    %c0_i32_6 = arith.constant 0 : i32
    %13 = arith.cmpi ne, %12, %c0_i32_6 : i32
    scf.if %13 {
      %c250_i32 = arith.constant 250 : i32
      %16 = arith.subi %c250_i32, %6 : i32
      %17 = vector.broadcast %16 : i32 to vector<16x256xi32>
      %18 = arith.cmpi slt, %7, %17 : vector<16x256xi32>
      %cst_8 = arith.constant -1.000000e+30 : f32
      %19 = vector.broadcast %cst_8 : f32 to vector<16x256xf32>
      %20 = arith.select %18, %5, %19 : vector<16x256xi1>, vector<16x256xf32>
      %c0_9 = arith.constant 0 : index
      %c0_10 = arith.constant 0 : index
      %21 = vector.load %arg7[%c0_9, %c0_10] : memref<16x1xf32, #tpu.memory_space<vmem>>, vector<16x1xf32>
      %cst_11 = arith.constant dense<0xFF800000> : vector<16xf32>
      %22 = vector.multi_reduction <maximumf>, %20, %cst_11 [1] : vector<16x256xf32> to vector<16xf32>
      %23 = vector.shape_cast %22 : vector<16xf32> to vector<16x1xf32>
      %24 = arith.maximumf %21, %23 : vector<16x1xf32>
      %25 = arith.subf %21, %24 : vector<16x1xf32>
      %26 = math.exp %25 : vector<16x1xf32>
      %c0_12 = arith.constant 0 : index
      %c0_13 = arith.constant 0 : index
      %27 = vector.load %arg8[%c0_12, %c0_13] : memref<16x1xf32, #tpu.memory_space<vmem>>, vector<16x1xf32>
      %28 = arith.mulf %26, %27 : vector<16x1xf32>
      %29 = vector.broadcast %24 : vector<16x1xf32> to vector<16x256xf32>
      %30 = arith.subf %20, %29 : vector<16x256xf32>
      %31 = math.exp %30 : vector<16x256xf32>
      %cst_14 = arith.constant dense<0.000000e+00> : vector<16xf32>
      %32 = vector.multi_reduction <add>, %31, %cst_14 [1] : vector<16x256xf32> to vector<16xf32>
      %33 = vector.shape_cast %32 : vector<16xf32> to vector<16x1xf32>
      %34 = arith.addf %28, %33 : vector<16x1xf32>
      %c0_15 = arith.constant 0 : index
      %c0_16 = arith.constant 0 : index
      %35 = vector.load %arg8[%c0_15, %c0_16] : memref<16x1xf32, #tpu.memory_space<vmem>>, vector<16x1xf32>
      tpu.vector_store %arg8[%c0_15, %c0_16], %34 {strides = array<i32>} : memref<16x1xf32, #tpu.memory_space<vmem>>, vector<16x1xf32>,
      %c0_17 = arith.constant 0 : index
      %c0_18 = arith.constant 0 : index
      %36 = vector.load %arg7[%c0_17, %c0_18] : memref<16x1xf32, #tpu.memory_space<vmem>>, vector<16x1xf32>
      tpu.vector_store %arg7[%c0_17, %c0_18], %24 {strides = array<i32>} : memref<16x1xf32, #tpu.memory_space<vmem>>, vector<16x1xf32>,
      %c0_19 = arith.constant 0 : index
      %c0_20 = arith.constant 0 : index
      %37 = vector.load %arg9[%c0_19, %c0_20] : memref<16x1xf32, #tpu.memory_space<vmem>>, vector<16x1xf32>
      %c0_21 = arith.constant 0 : index
      %c0_22 = arith.constant 0 : index
      %38 = vector.load %arg4[%c0_21, %c0_22] : memref<16x1xi32, #tpu.memory_space<vmem>>, vector<16x1xi32>
      %39 = vector.broadcast %6 : i32 to vector<16x1xi32>
      %40 = arith.subi %38, %39 : vector<16x1xi32>
      %41 = vector.broadcast %40 : vector<16x1xi32> to vector<16x256xi32>
      %42 = arith.cmpi eq, %7, %41 : vector<16x256xi32>
      %cst_23 = arith.constant 0.000000e+00 : f32
      %43 = vector.broadcast %cst_23 : f32 to vector<16x256xf32>
      %44 = arith.select %42, %20, %43 : vector<16x256xi1>, vector<16x256xf32>
      %cst_24 = arith.constant dense<0.000000e+00> : vector<16xf32>
      %45 = vector.multi_reduction <add>, %44, %cst_24 [1] : vector<16x256xf32> to vector<16xf32>
      %46 = vector.shape_cast %45 : vector<16xf32> to vector<16x1xf32>
      %47 = arith.addf %37, %46 : vector<16x1xf32>
      %c0_25 = arith.constant 0 : index
      %c0_26 = arith.constant 0 : index
      %48 = vector.load %arg9[%c0_25, %c0_26] : memref<16x1xf32, #tpu.memory_space<vmem>>, vector<16x1xf32>
      tpu.vector_store %arg9[%c0_25, %c0_26], %47 {strides = array<i32>} : memref<16x1xf32, #tpu.memory_space<vmem>>, vector<16x1xf32>,
    } else {
    }
    %14 = arith.extui %8 : i1 to i32
    %c0_i32_7 = arith.constant 0 : i32
    %15 = arith.cmpi ne, %14, %c0_i32_7 : i32
    scf.if %15 {
      %c0_8 = arith.constant 0 : index
      %c0_9 = arith.constant 0 : index
      %16 = vector.load %arg7[%c0_8, %c0_9] : memref<16x1xf32, #tpu.memory_space<vmem>>, vector<16x1xf32>
      %c0_10 = arith.constant 0 : index
      %c0_11 = arith.constant 0 : index
      %17 = vector.load %arg8[%c0_10, %c0_11] : memref<16x1xf32, #tpu.memory_space<vmem>>, vector<16x1xf32>
      %18 = math.log %17 : vector<16x1xf32>
      %19 = arith.addf %16, %18 : vector<16x1xf32>
      %c0_12 = arith.constant 0 : index
      %c0_13 = arith.constant 0 : index
      %20 = vector.load %arg9[%c0_12, %c0_13] : memref<16x1xf32, #tpu.memory_space<vmem>>, vector<16x1xf32>
      %21 = arith.subf %19, %20 : vector<16x1xf32>
      %c0_14 = arith.constant 0 : index
      %c0_15 = arith.constant 0 : index
      %22 = vector.load %arg5[%c0_14, %c0_15] : memref<16x1xf32, #tpu.memory_space<vmem>>, vector<16x1xf32>
      %23 = arith.mulf %21, %22 : vector<16x1xf32>
      %c0_16 = arith.constant 0 : index
      %c0_17 = arith.constant 0 : index
      %24 = vector.load %arg6[%c0_16, %c0_17] : memref<16x1xf32, #tpu.memory_space<vmem>>, vector<16x1xf32>
      tpu.vector_store %arg6[%c0_16, %c0_17], %23 {strides = array<i32>} : memref<16x1xf32, #tpu.memory_space<vmem>>, vector<16x1xf32>,
    } else {
    }
    return
  }
  func.func @transform_0(%arg0: i32, %arg1: i32) -> (i32, i32) {
    %c0_i32 = arith.constant 0 : i32
    %c0_i32_0 = arith.constant 0 : i32
    return %arg0, %c0_i32 : i32, i32
  }
  func.func @transform_1(%arg0: i32, %arg1: i32) -> (i32, i32) {
    %c0_i32 = arith.constant 0 : i32
    %c0_i32_0 = arith.constant 0 : i32
    return %c0_i32, %arg1 : i32, i32
  }
  func.func @transform_2(%arg0: i32, %arg1: i32) -> (i32, i32) {
    %c0_i32 = arith.constant 0 : i32
    %c0_i32_0 = arith.constant 0 : i32
    return %arg0, %c0_i32 : i32, i32
  }
  func.func @transform_3(%arg0: i32, %arg1: i32) -> (i32, i32) {
    %c0_i32 = arith.constant 0 : i32
    %c0_i32_0 = arith.constant 0 : i32
    return %arg0, %c0_i32 : i32, i32
  }
  func.func @transform_4(%arg0: i32, %arg1: i32) -> (i32, i32) {
    %c0_i32 = arith.constant 0 : i32
    %c0_i32_0 = arith.constant 0 : i32
    return %arg0, %c0_i32 : i32, i32
  }
}

</mosaic_0001>

<bundles_post_ra>
// kernel: loss_wrapper_forward.3
= control target key start
LH: loop header
LB: loop body
LE: loop exit
PB: predicated region body
PF: predicated region fallthrough
CT: control target
= control target key end

     0   :  { %v312_v0 = vmov 0.0   ;;  %vm313_vm0 = vmmov 0   ;;  %vm52_vm1 = vcmask 261120   ;;  %v314_v4 = vmov 0   ;;  %s382_s1 = inlined_call_operand.vmem [shape: bf16[32,128], index: 1, kind: input, shape index: {}]   ;;  %s383_s0 = inlined_call_operand.vmem [shape: bf16[16,32], index: 0, kind: input, shape index: {}]   ;;  %s384_s2 = inlined_call_operand.vmem [shape: s32[16,1], index: 2, kind: input, shape index: {}]   ;;  %s385_s3 = inlined_call_operand.vmem [shape: f32[16,1], index: 3, kind: input, shape index: {}]   ;;  %s386_s4 = inlined_call_operand.vmem [shape: f32[16,1], index: 4, kind: output, shape index: {}]  }
   0x1   :  { %283 = vmatprep.subr.bf16.mxu0 %v312_v0  ;;  %v297_v1 = vld [vmem:[%s382_s1] sm:$0xff]   ;;  %287 = vmatprep.mubr.msk.bf16.mxu0 %vm313_vm0, %v312_v0  ;;  %v298_v2 = vld [vmem:[%s382_s1 + $0x8] sm:$0xff]   ;;  %vm22_vm2 = vcmask 7168   ;;  %v315_v5 = vmov -1e+30   ;;  %v98_v6 = vlaneseq }
   0x2   :  { %284 = vmatpush3.bf16.msra.mxu0 %v297_v1  ;;  %v299_v3 = vld [vmem:[%s383_s0] sm:$0xff]   ;;  %296 = vset.pattern.permute.xlu0 %v314_v4  ;;  %23 = vst.msk [vmem:[#allocation2] sm:$0xff] %vm22_vm2, %v315_v5  ;;  %24 = vst.msk [vmem:[#allocation2 + $0x8] sm:$0xff] %vm22_vm2, %v315_v5  ;;  %v230_v23 = vld [vmem:[%s384_s2 + $0x8] sm:$0xff] }
   0x3   :  { %285 = vmatprep.subr.bf16.mxu0 %v312_v0  ;;  %295 = vset.pattern.permute.xlu1 %v314_v4  ;;  %25 = vst.msk [vmem:[#allocation3] sm:$0xff] %vm22_vm2, %v312_v0  ;;  %26 = vst.msk [vmem:[#allocation3 + $0x8] sm:$0xff] %vm22_vm2, %v312_v0  ;;  %v99_v7 = vand.u32 127, %v98_v6  ;;  %v229_v14 = vld [vmem:[%s384_s2] sm:$0xff]  ;;  %v267_v4 = vld [vmem:[%s385_s3 + $0x8] sm:$0xff] }
   0x4   :  { %27 = vst.msk [vmem:[#allocation4] sm:$0xff] %vm22_vm2, %v312_v0  ;;  %28 = vst.msk [vmem:[#allocation4 + $0x8] sm:$0xff] %vm22_vm2, %v312_v0  ;;  %v266_v62 = vld [vmem:[%s385_s3] sm:$0xff] }
   0x5   :  { %vm179_vm3 = vcmp.lt.s32.totalorder %v99_v7, 120 }
   0x6   :  { %286 = vmatpush3.bf16.msra.mxu0 %v298_v2 }
   0x9   :  { %288 = vmatmul.mubr.msk.bf16.vlgmr.msra.gmra.mrb[0].mxu0 %vm52_vm1, %v299_v3  ;;  %v182_v15 = vld [vmem:[#allocation2] sm:$0xff]  ;;  %v183_v18 = vld [vmem:[#allocation2 + $0x8] sm:$0xff] }
   0xa   :  { %v196_v42 = vld [vmem:[#allocation3] sm:$0xff]  ;;  %v197_v46 = vld [vmem:[#allocation3 + $0x8] sm:$0xff] }
   0xb   :  { %v227_v36 = vld [vmem:[#allocation4] sm:$0xff]  ;;  %v228_v51 = vld [vmem:[#allocation4 + $0x8] sm:$0xff] }
  0xdc   :  { %v90_v8 = vpop.f32.mrb[0].mxu0 }
  0xdd   :  { %v180_v9 = vsel %vm179_vm3, %v90_v8, -1e+30  ;;  %v289_v10 = vpop.f32.mrb[1].mxu0 }
  0xde   :  { %184 = vmax.xlane.f32.xlu0 %v180_v9  ;;  %v93_v11 = vpop.f32.mrb[2].mxu0 }
  0xdf   :  { %v290_v12 = vpop.f32.mrb[3].mxu0  ;;  %v181_v13 = vsel %vm179_vm3, %v93_v11, -1e+30 }
  0xe2   :  { %186 = vmax.xlane.f32.xlu0 %v181_v13 }
  0xf8   :  { %235 = vperm.xlu0 %296, %v229_v14  }
 0x16b   :  { %v185_v16 = vpop.xlane.xlu0 %184 }
 0x16c   :  { %v188_v17 = vmax.f32 %v182_v15, %v185_v16 }
 0x16e   :  { %v190_v19 = vsub.f32 %v182_v15, %v188_v17  ;;  %225 = vst.msk [vmem:[#allocation2] sm:$0xff] %vm22_vm2, %v188_v17  ;;  %202 = vperm.xlu1 %295, %v188_v17  }
 0x16f   :  { %v187_v20 = vpop.xlane.xlu0 %186 }
 0x170   :  { %v189_v21 = vmax.f32 %v183_v18, %v187_v20  ;;  %v192_v39 = vmul.f32 1.442695, %v190_v19 }
 0x172   :  { %v191_v22 = vsub.f32 %v183_v18, %v189_v21  ;;  %226 = vst.msk [vmem:[#allocation2 + $0x8] sm:$0xff] %vm22_vm2, %v189_v21  ;;  %207 = vperm.xlu1 %295, %v189_v21  }
 0x174   :  { %v194_v40 = vmul.f32 1.442695, %v191_v22 }
 0x175   :  { %v252_v58 = vld [vmem:[#allocation2] sm:$0xff] }
 0x176   :  { %238 = vperm.xlu1 %295, %v230_v23  }
 0x177   :  { %v236_v24 = vpop.permute.xlu0 %235 }
 0x178   :  { %vm240_vm4 = vcmp.eq.s32.totalorder %v99_v7, %v236_v24 }
 0x179   :  { %v242_v25 = vsel %vm240_vm4, %v180_v9, 0.0  ;;  %v253_v1 = vld [vmem:[#allocation2 + $0x8] sm:$0xff] }
 0x17a   :  { %244 = vadd.xlane.f32.xlu0 %v242_v25 }
 0x1ed   :  { %v203_v26 = vpop.permute.xlu1 %202 }
 0x1ee   :  { %v210_v27 = vsub.f32 %v180_v9, %v203_v26 }
 0x1f0   :  { %v212_v28 = vmul.f32 1.442695, %v210_v27 }
 0x1f1   :  { %v208_v29 = vpop.permute.xlu1 %207 }
 0x1f2   :  { %300 = vpow2.f32 %v212_v28  ;;  %v211_v30 = vsub.f32 %v181_v13, %v208_v29 }
 0x1f4   :  { %v214_v31 = vmul.f32 1.442695, %v211_v30 }
 0x1f5   :  { %v239_v33 = vpop.permute.xlu1 %238 }
 0x1f6   :  { %302 = vpow2.f32 %v214_v31  ;;  %vm241_vm5 = vcmp.eq.s32.totalorder %v99_v7, %v239_v33 }
 0x1f7   :  { %v243_v35 = vsel %vm241_vm5, %v181_v13, 0.0  ;;  %304 = vpow2.f32 %v192_v39 }
 0x1f8   :  { %306 = vpow2.f32 %v194_v40 }
 0x1fc   :  { %v301_v32 = vpop.eup %300 }
 0x1fd   :  { %216 = vadd.xlane.f32.xlu1 %v301_v32 }
 0x200   :  { %v303_v34 = vpop.eup %302 }
 0x201   :  { %218 = vadd.xlane.f32.xlu1 %v303_v34  ;;  %v305_v41 = vpop.eup %304 }
 0x202   :  { %v198_v43 = vmul.f32 %v305_v41, %v196_v42  ;;  %v307_v44 = vpop.eup %306 }
 0x203   :  { %v199_v48 = vmul.f32 %v307_v44, %v197_v46 }
 0x205   :  { %246 = vadd.xlane.f32.xlu1 %v243_v35 }
 0x207   :  { %v245_v37 = vpop.xlane.xlu0 %244 }
 0x208   :  { %v248_v38 = vadd.f32 %v245_v37, %v227_v36 }
 0x20a   :  { %250 = vst.msk [vmem:[#allocation4] sm:$0xff] %vm22_vm2, %v248_v38 }
 0x211   :  { %v262_v61 = vld [vmem:[#allocation4] sm:$0xff] }
 0x28a   :  { %v217_v45 = vpop.xlane.xlu1 %216 }
 0x28b   :  { %v220_v47 = vadd.f32 %v217_v45, %v198_v43 }
 0x28d   :  { %223 = vst.msk [vmem:[#allocation3] sm:$0xff] %vm22_vm2, %v220_v47 }
 0x28e   :  { %v219_v49 = vpop.xlane.xlu1 %218 }
 0x28f   :  { %v221_v50 = vadd.f32 %v219_v49, %v199_v48 }
 0x291   :  { %224 = vst.msk [vmem:[#allocation3 + $0x8] sm:$0xff] %vm22_vm2, %v221_v50 }
 0x292   :  { %v247_v52 = vpop.xlane.xlu1 %246 }
 0x293   :  { %v249_v53 = vadd.f32 %v247_v52, %v228_v51 }
 0x294   :  { %v254_v54 = vld [vmem:[#allocation3] sm:$0xff] }
 0x295   :  { %308 = vlog2.f32 %v254_v54  ;;  %251 = vst.msk [vmem:[#allocation4 + $0x8] sm:$0xff] %vm22_vm2, %v249_v53 }
 0x298   :  { %v255_v55 = vld [vmem:[#allocation3 + $0x8] sm:$0xff] }
 0x299   :  { %310 = vlog2.f32 %v255_v55 }
 0x29c   :  { %v263_v5 = vld [vmem:[#allocation4 + $0x8] sm:$0xff] }
 0x29f   :  { %v309_v56 = vpop.eup %308 }
 0x2a0   :  { %v257_v57 = vmul.f32 0.6931472, %v309_v56 }
 0x2a2   :  { %v260_v59 = vadd.f32 %v257_v57, %v252_v58 }
 0x2a3   :  { %v311_v60 = vpop.eup %310 }
 0x2a4   :  { %v259_v63 = vmul.f32 0.6931472, %v311_v60  ;;  %v264_v0 = vsub.f32 %v260_v59, %v262_v61 }
 0x2a6   :  { %v261_v2 = vadd.f32 %v259_v63, %v253_v1  ;;  %v268_v3 = vmul.f32 %v266_v62, %v264_v0 }
 0x2a8   :  { %v265_v6 = vsub.f32 %v261_v2, %v263_v5  ;;  %270 = vst.msk [vmem:[%s386_s4] sm:$0xff] %vm22_vm2, %v268_v3 }
 0x2aa   :  { %v269_v7 = vmul.f32 %v267_v4, %v265_v6 }
 0x2ac   :  { %271 = vst.msk [vmem:[%s386_s4 + $0x8] sm:$0xff] %vm22_vm2, %v269_v7 }

// kernel: loss_wrapper_forward.2
= control target key start
LH: loop header
LB: loop body
LE: loop exit
PB: predicated region body
PF: predicated region fallthrough
CT: control target
= control target key end

     0   :  { %v356_v1 = vmov 0   ;;  %vm60_vm0 = vcmask 261120   ;;  %vm22_vm1 = vcmask 7168   ;;  %v357_v6 = vmov -1e+30   ;;  %s441_s1 = inlined_call_operand.vmem [shape: bf16[32,256], index: 1, kind: input, shape index: {}]   ;;  %s442_s0 = inlined_call_operand.vmem [shape: bf16[16,32], index: 0, kind: input, shape index: {}]   ;;  %s443_s2 = inlined_call_operand.vmem [shape: s32[16,1], index: 2, kind: input, shape index: {}]   ;;  %s444_s3 = inlined_call_operand.vmem [shape: f32[16,1], index: 3, kind: input, shape index: {}]   ;;  %s445_s4 = inlined_call_operand.vmem [shape: f32[16,1], index: 4, kind: output, shape index: {}]  }
   0x1   :  { %v333_v0 = vld [vmem:[%s441_s1 + $0x4] ss:$8 sps:$4 sm:$0xff]   ;;  %96 = vmatprep.mubr.bf16.mxu0 %v356_v1  ;;  %332 = vset.pattern.permute.xlu0 %v356_v1  ;;  %v335_v2 = vld [vmem:[%s441_s1] ss:$8 sps:$4 sm:$0xff]   ;;  %v336_v3 = vld [vmem:[%s441_s1 + $0x14] ss:$8 sps:$4 sm:$0xff]   ;;  %v108_v7 = vlaneseq }
   0x2   :  { %331 = vset.pattern.permute.xlu1 %v356_v1  ;;  %64 = vmatprep.subr.bf16.mxu0 %v333_v0  ;;  %v338_v4 = vld [vmem:[%s441_s1 + $0x10] ss:$8 sps:$4 sm:$0xff]   ;;  %v339_v5 = vld [vmem:[%s442_s0] sm:$0xff]   ;;  %23 = vst.msk [vmem:[#allocation2] sm:$0xff] %vm22_vm1, %v357_v6  ;;  %24 = vst.msk [vmem:[#allocation2 + $0x8] sm:$0xff] %vm22_vm1, %v357_v6  ;;  %v358_v19 = vmov 0.0  }
   0x3   :  { %65 = vmatpush1.bf16.msra.mxu0 %v335_v2  ;;  %v401_v8 = vand.u32 127, %v108_v7  ;;  %v269_v18 = vld [vmem:[%s443_s2] sm:$0xff]  ;;  %27 = vst.msk [vmem:[#allocation4] sm:$0xff] %vm22_vm1, %v358_v19  ;;  %25 = vst.msk [vmem:[#allocation3] sm:$0xff] %vm22_vm1, %v358_v19  ;;  %v270_v28 = vld [vmem:[%s443_s2 + $0x8] sm:$0xff] }
   0x4   :  { %66 = vmatprep.subr.bf16.mxu0 %v336_v3  ;;  %26 = vst.msk [vmem:[#allocation3 + $0x8] sm:$0xff] %vm22_vm1, %v358_v19  ;;  %28 = vst.msk [vmem:[#allocation4 + $0x8] sm:$0xff] %vm22_vm1, %v358_v19 }
   0x5   :  { %v404_v9 = vadd.s32 128, %v401_v8 }
   0x7   :  { %67 = vmatpush1.bf16.msra.mxu0 %v338_v4  ;;  %vm207_vm2 = vcmp.lt.s32.totalorder %v404_v9, 250 }
   0x9   :  { %v212_v20 = vld [vmem:[#allocation2] sm:$0xff]  ;;  %v213_v23 = vld [vmem:[#allocation2 + $0x8] sm:$0xff] }
   0xa   :  { %327 = vmatmul.mubr.msk.bf16.vlgmr.msra.gmra.mrb[0].mxu0 %vm60_vm0, %v339_v5  ;;  %v267_v53 = vld [vmem:[#allocation4] sm:$0xff]  ;;  %v228_v59 = vld [vmem:[#allocation3] sm:$0xff] }
   0xb   :  { %v229_v63 = vld [vmem:[#allocation3 + $0x8] sm:$0xff]  ;;  %v268_v4 = vld [vmem:[#allocation4 + $0x8] sm:$0xff] }
  0xdd   :  { %v98_v10 = vpop.f32.mrb[0].mxu0 }
  0xde   :  { %v100_v11 = vpop.f32.mrb[1].mxu0 }
  0xdf   :  { %v209_v12 = vsel %vm207_vm2, %v100_v11, -1e+30  ;;  %v102_v13 = vpop.f32.mrb[2].mxu0 }
  0xe0   :  { %v104_v14 = vpop.f32.mrb[3].mxu0  ;;  %v214_v15 = vmax.f32 %v98_v10, %v209_v12 }
  0xe1   :  { %v211_v16 = vsel %vm207_vm2, %v104_v14, -1e+30 }
  0xe2   :  { %215 = vmax.xlane.f32.xlu0 %v214_v15  ;;  %v217_v17 = vmax.f32 %v102_v13, %v211_v16  ;;  %v312_v15 = vld [vmem:[%s444_s3] sm:$0xff] }
  0xe6   :  { %218 = vmax.xlane.f32.xlu0 %v217_v17 }
  0xfc   :  { %275 = vperm.xlu0 %332, %v269_v18  }
 0x16f   :  { %v216_v21 = vpop.xlane.xlu0 %215 }
 0x170   :  { %v220_v22 = vmax.f32 %v212_v20, %v216_v21  ;;  %v313_v21 = vld [vmem:[%s444_s3 + $0x8] sm:$0xff] }
 0x172   :  { %v222_v24 = vsub.f32 %v212_v20, %v220_v22  ;;  %265 = vst.msk [vmem:[#allocation2] sm:$0xff] %vm22_vm1, %v220_v22  ;;  %234 = vperm.xlu1 %331, %v220_v22  }
 0x173   :  { %v219_v25 = vpop.xlane.xlu0 %218 }
 0x174   :  { %v221_v26 = vmax.f32 %v213_v23, %v219_v25  ;;  %v224_v56 = vmul.f32 1.442695, %v222_v24 }
 0x176   :  { %v223_v27 = vsub.f32 %v213_v23, %v221_v26  ;;  %266 = vst.msk [vmem:[#allocation2 + $0x8] sm:$0xff] %vm22_vm1, %v221_v26  ;;  %239 = vperm.xlu1 %331, %v221_v26  }
 0x178   :  { %v226_v57 = vmul.f32 1.442695, %v223_v27 }
 0x179   :  { %v298_v11 = vld [vmem:[#allocation2] sm:$0xff] }
 0x17a   :  { %278 = vperm.xlu1 %331, %v270_v28  }
 0x17b   :  { %v276_v29 = vpop.permute.xlu0 %275 }
 0x17c   :  { %vm280_vm3 = vcmp.eq.s32.totalorder %v401_v8, %v276_v29  ;;  %vm281_vm4 = vcmp.eq.s32.totalorder %v404_v9, %v276_v29 }
 0x17d   :  { %v284_v30 = vsel %vm280_vm3, %v98_v10, 0.0  ;;  %v285_v31 = vsel %vm281_vm4, %v209_v12, 0.0  ;;  %v299_v18 = vld [vmem:[#allocation2 + $0x8] sm:$0xff] }
 0x17e   :  { %v288_v32 = vadd.f32 %v285_v31, %v284_v30 }
 0x180   :  { %289 = vadd.xlane.f32.xlu0 %v288_v32 }
 0x1f1   :  { %v235_v33 = vpop.permute.xlu1 %234 }
 0x1f2   :  { %v242_v34 = vsub.f32 %v98_v10, %v235_v33  ;;  %v243_v35 = vsub.f32 %v209_v12, %v235_v33 }
 0x1f4   :  { %v246_v36 = vmul.f32 1.442695, %v242_v34  ;;  %v248_v37 = vmul.f32 1.442695, %v243_v35 }
 0x1f5   :  { %v240_v38 = vpop.permute.xlu1 %239 }
 0x1f6   :  { %340 = vpow2.f32 %v246_v36  ;;  %v244_v39 = vsub.f32 %v102_v13, %v240_v38  ;;  %v245_v40 = vsub.f32 %v211_v16, %v240_v38 }
 0x1f7   :  { %342 = vpow2.f32 %v248_v37 }
 0x1f8   :  { %v250_v41 = vmul.f32 1.442695, %v244_v39  ;;  %v252_v42 = vmul.f32 1.442695, %v245_v40 }
 0x1f9   :  { %v279_v45 = vpop.permute.xlu1 %278 }
 0x1fa   :  { %344 = vpow2.f32 %v250_v41  ;;  %vm282_vm5 = vcmp.eq.s32.totalorder %v401_v8, %v279_v45  ;;  %vm283_vm6 = vcmp.eq.s32.totalorder %v404_v9, %v279_v45 }
 0x1fb   :  { %346 = vpow2.f32 %v252_v42  ;;  %v286_v50 = vsel %vm282_vm5, %v102_v13, 0.0  ;;  %v287_v51 = vsel %vm283_vm6, %v211_v16, 0.0 }
 0x1fc   :  { %v291_v52 = vadd.f32 %v287_v51, %v286_v50  ;;  %348 = vpow2.f32 %v224_v56 }
 0x1fd   :  { %350 = vpow2.f32 %v226_v57 }
 0x200   :  { %v341_v43 = vpop.eup %340 }
 0x201   :  { %v343_v44 = vpop.eup %342 }
 0x202   :  { %v254_v46 = vadd.f32 %v343_v44, %v341_v43 }
 0x204   :  { %v345_v47 = vpop.eup %344  ;;  %255 = vadd.xlane.f32.xlu1 %v254_v46 }
 0x205   :  { %v347_v48 = vpop.eup %346 }
 0x206   :  { %v257_v49 = vadd.f32 %v347_v48, %v345_v47  ;;  %v349_v58 = vpop.eup %348 }
 0x207   :  { %v230_v60 = vmul.f32 %v349_v58, %v228_v59  ;;  %v351_v61 = vpop.eup %350 }
 0x208   :  { %258 = vadd.xlane.f32.xlu1 %v257_v49  ;;  %v231_v1 = vmul.f32 %v351_v61, %v229_v63 }
 0x20c   :  { %292 = vadd.xlane.f32.xlu1 %v291_v52 }
 0x20d   :  { %v290_v54 = vpop.xlane.xlu0 %289 }
 0x20e   :  { %v294_v55 = vadd.f32 %v290_v54, %v267_v53 }
 0x210   :  { %296 = vst.msk [vmem:[#allocation4] sm:$0xff] %vm22_vm1, %v294_v55 }
 0x217   :  { %v308_v14 = vld [vmem:[#allocation4] sm:$0xff] }
 0x291   :  { %v256_v62 = vpop.xlane.xlu1 %255 }
 0x292   :  { %v260_v0 = vadd.f32 %v256_v62, %v230_v60 }
 0x294   :  { %263 = vst.msk [vmem:[#allocation3] sm:$0xff] %vm22_vm1, %v260_v0 }
 0x295   :  { %v259_v2 = vpop.xlane.xlu1 %258 }
 0x296   :  { %v261_v3 = vadd.f32 %v259_v2, %v231_v1 }
 0x298   :  { %264 = vst.msk [vmem:[#allocation3 + $0x8] sm:$0xff] %vm22_vm1, %v261_v3 }
 0x299   :  { %v293_v5 = vpop.xlane.xlu1 %292 }
 0x29a   :  { %v295_v6 = vadd.f32 %v293_v5, %v268_v4 }
 0x29b   :  { %v300_v7 = vld [vmem:[#allocation3] sm:$0xff] }
 0x29c   :  { %352 = vlog2.f32 %v300_v7  ;;  %297 = vst.msk [vmem:[#allocation4 + $0x8] sm:$0xff] %vm22_vm1, %v295_v6 }
 0x29f   :  { %v301_v8 = vld [vmem:[#allocation3 + $0x8] sm:$0xff] }
 0x2a0   :  { %354 = vlog2.f32 %v301_v8 }
 0x2a3   :  { %v309_v22 = vld [vmem:[#allocation4 + $0x8] sm:$0xff] }
 0x2a6   :  { %v353_v9 = vpop.eup %352 }
 0x2a7   :  { %v303_v10 = vmul.f32 0.6931472, %v353_v9 }
 0x2a9   :  { %v306_v12 = vadd.f32 %v303_v10, %v298_v11 }
 0x2aa   :  { %v355_v13 = vpop.eup %354 }
 0x2ab   :  { %v305_v16 = vmul.f32 0.6931472, %v355_v13  ;;  %v310_v17 = vsub.f32 %v306_v12, %v308_v14 }
 0x2ad   :  { %v307_v19 = vadd.f32 %v305_v16, %v299_v18  ;;  %v314_v20 = vmul.f32 %v312_v15, %v310_v17 }
 0x2af   :  { %v311_v23 = vsub.f32 %v307_v19, %v309_v22  ;;  %316 = vst.msk [vmem:[%s445_s4] sm:$0xff] %vm22_vm1, %v314_v20 }
 0x2b1   :  { %v315_v24 = vmul.f32 %v313_v21, %v311_v23 }
 0x2b3   :  { %317 = vst.msk [vmem:[%s445_s4 + $0x8] sm:$0xff] %vm22_vm1, %v315_v24 }

</bundles_post_ra>
